<compile_context>
chip_gen: v5e
topology: v5e:2x2
jax: 0.10.0
libtpu: 0.0.40
codegen_flags: <defaults>
</compile_context>

<pallas_src>
import functools

import jax
import jax.numpy as jnp
from jax.experimental import pallas as pl
from jax.experimental.pallas import tpu as pltpu


def _pick_tile(dim, pref, align):
    """Largest multiple of `align` <= pref that evenly divides `dim`.

    Small dims (<= pref) or dims not divisible by `align` use the full extent.
    """
    if dim <= pref or dim % align != 0:
        return dim
    t = pref - (pref % align)
    while t >= align:
        if dim % t == 0:
            return t
        t -= align
    return dim


def _vmem_footprint_bytes(tm, tn, tk, w_buffers):
    # double-buffered x + bias, `w_buffers`-deep W, double-buffered resident output.
    return 4 * (2 * (tm * tk + tn) + w_buffers * tk * tn + 2 * tm * tn)


def _input_dependent_kernel(x_ref, w_ref, b_ref, o_ref, *, nl):
    k = pl.program_id(2)

    @pl.when(k == 0)
    def _():
        # Output tile doubles as the f32 accumulator; seed it with the bias.
        o_ref[...] = jnp.broadcast_to(b_ref[...], o_ref.shape).astype(o_ref.dtype)

    x = x_ref[...]                                # (tm, tk)
    # Fused VPU operand: (x + nl*x^2) -> one MXU matmul instead of two.
    y = x + nl * (x * x)

    # W is pre-relaid-out to (K, N); plain contraction, no in-kernel transpose.
    o_ref[...] += jnp.dot(y, w_ref[...], preferred_element_type=jnp.float32)


def input_dependent_layer(x, weight, bias, nl,
                          *, tm_pref=256, tn_pref=512, tk_pref=1024,
                          w_buffers=2,
                          vmem_budget_bytes=48 * 1024 * 1024):
    """Eval-mode forward of InputDependentLayer.

    x:      (B, in_features)                 float32
    weight: (out_features, in_features)      float32 (PyTorch nn.Linear layout)
    bias:   (out_features,)                  float32
    nl:     python float (static)
    """
    B, K = x.shape
    N, K2 = weight.shape
    assert K == K2
    assert x.dtype == jnp.float32, "output tile is the accumulator; keep f32"

    # One-time HBM relayouts outside the kernel (amortized; weights are static).
    w_kn = weight.T                              # (K, N): MXU-friendly RHS layout
    b2d = bias.reshape(1, N)                     # 2D for TPU layout

    tm = _pick_tile(B, tm_pref, 8)
    tn = _pick_tile(N, tn_pref, 128)
    tk = _pick_tile(K, tk_pref, 128)

    # Hard VMEM cap (v7x has 64 MiB/TC): shrink divisible tiles until we fit.
    while _vmem_footprint_bytes(tm, tn, tk, w_buffers) > vmem_budget_bytes:
        if tk >= 256 and (tk // 2) % 128 == 0:
            tk //= 2
        elif tn >= 256 and (tn // 2) % 128 == 0:
            tn //= 2
        elif tm >= 16 and (tm // 2) % 8 == 0:
            tm //= 2
        else:
            break  # ragged fallback tiles; rely on vmem_limit_bytes

    grid = (B // tm, N // tn, K // tk)
    n_i, n_j = grid[0], grid[1]

    kernel = functools.partial(_input_dependent_kernel, nl=float(nl))

    cost = pl.CostEstimate(
        flops=2 * B * K * N + 2 * B * K + B * N,
        transcendentals=0,
        # Honest re-streaming accounting: x read n_j times, W read n_i times.
        bytes_accessed=4 * (B * K * n_j + K * N * n_i + N * n_i * n_j + B * N),
    )

    w_spec_kwargs = {}
    if w_buffers != 2:
        w_spec_kwargs["pipeline_mode"] = pl.Buffered(w_buffers)

    return pl.pallas_call(
        kernel,
        out_shape=jax.ShapeDtypeStruct((B, N), x.dtype),
        grid_spec=pltpu.PrefetchScalarGridSpec(
            num_scalar_prefetch=0,
            grid=grid,
            in_specs=[
                pl.BlockSpec((tm, tk), lambda i, j, k: (i, k)),                  # x tile
                pl.BlockSpec((tk, tn), lambda i, j, k: (k, j), **w_spec_kwargs), # W tile (K,N)
                pl.BlockSpec((1, tn), lambda i, j, k: (0, j)),                   # bias tile
            ],
            out_specs=pl.BlockSpec((tm, tn), lambda i, j, k: (i, j)),
        ),
        compiler_params=pltpu.CompilerParams(
            dimension_semantics=("parallel", "parallel", "arbitrary"),
            vmem_limit_bytes=64 * 1024 * 1024,
        ),
        cost_estimate=cost,
    )(x, w_kn, b2d)


def reference(x, weight, bias, nl):
    x_sq = x ** 2
    return x @ weight.T + nl * (x_sq @ weight.T) + bias


if __name__ == "__main__":
    # Small shapes consistent with the module: batch=8, in_features=32, out_features=32
    B, IN, OUT = 8, 32, 32
    NL = 0.1

    key = jax.random.PRNGKey(0)
    kx, kw, kb = jax.random.split(key, 3)

    x = jax.random.normal(kx, (B, IN), dtype=jnp.float32)
    # Deterministic "nn.Linear"-like parameters (synthetic, not a checkpoint).
    bound = 1.0 / (IN ** 0.5)
    weight = jax.random.uniform(kw, (OUT, IN), minval=-bound, maxval=bound,
                                dtype=jnp.float32)
    bias = jax.random.uniform(kb, (OUT,), minval=-bound, maxval=bound,
                              dtype=jnp.float32)

    out = input_dependent_layer(x, weight, bias, NL)
    out = jax.block_until_ready(out)

    ref = reference(x, weight, bias, NL)
    assert out.shape == (B, OUT)
    assert jnp.allclose(out, ref, atol=1e-5, rtol=1e-5), "mismatch vs reference"

    print("KERNEL_OK")
</pallas_src>

<mosaic_0001>
module attributes {stable_mosaic.version = 11 : i64} {
  func.func @_input_dependent_kernel(%arg0: i32, %arg1: i32, %arg2: i32, %arg3: memref<8x32xf32, #tpu.memory_space<vmem>>, %arg4: memref<32x32xf32, #tpu.memory_space<vmem>>, %arg5: memref<1x32xf32, #tpu.memory_space<vmem>>, %arg6: memref<8x32xf32, #tpu.memory_space<vmem>>) attributes {dimension_semantics = [#tpu.dimension_semantics<parallel>, #tpu.dimension_semantics<parallel>, #tpu.dimension_semantics<arbitrary>], iteration_bounds = array<i64: 1, 1, 1>, scalar_prefetch = 0 : i64, scratch_operands = 0 : i64, tpu.core_type = #tpu.core_type<tc>, window_params = [{transform_indices = @transform_0, window_bounds = array<i64: 8, 32>}, {transform_indices = @transform_1, window_bounds = array<i64: 32, 32>}, {transform_indices = @transform_2, window_bounds = array<i64: 1, 32>}, {transform_indices = @transform_3, window_bounds = array<i64: 8, 32>}]} {
    %c0_i32 = arith.constant 0 : i32
    %0 = arith.cmpi eq, %arg2, %c0_i32 : i32
    %1 = arith.extui %0 : i1 to i32
    %c0_i32_0 = arith.constant 0 : i32
    %2 = arith.cmpi ne, %1, %c0_i32_0 : i32
    scf.if %2 {
      %c0_9 = arith.constant 0 : index
      %c0_10 = arith.constant 0 : index
      %13 = vector.load %arg5[%c0_9, %c0_10] : memref<1x32xf32, #tpu.memory_space<vmem>>, vector<1x32xf32>
      %14 = vector.shape_cast %13 : vector<1x32xf32> to vector<1x32xf32>
      %15 = vector.broadcast %14 : vector<1x32xf32> to vector<8x32xf32>
      %c0_11 = arith.constant 0 : index
      %c0_12 = arith.constant 0 : index
      %16 = vector.load %arg6[%c0_11, %c0_12] : memref<8x32xf32, #tpu.memory_space<vmem>>, vector<8x32xf32>
      tpu.vector_store %arg6[%c0_11, %c0_12], %15 {strides = array<i32>} : memref<8x32xf32, #tpu.memory_space<vmem>>, vector<8x32xf32>,
    } else {
    }
    %c0 = arith.constant 0 : index
    %c0_1 = arith.constant 0 : index
    %3 = vector.load %arg3[%c0, %c0_1] : memref<8x32xf32, #tpu.memory_space<vmem>>, vector<8x32xf32>
    %4 = arith.mulf %3, %3 : vector<8x32xf32>
    %cst = arith.constant 1.000000e-01 : f32
    %5 = vector.broadcast %cst : f32 to vector<8x32xf32>
    %6 = arith.mulf %5, %4 : vector<8x32xf32>
    %7 = arith.addf %3, %6 : vector<8x32xf32>
    %c0_2 = arith.constant 0 : index
    %c0_3 = arith.constant 0 : index
    %8 = vector.load %arg6[%c0_2, %c0_3] : memref<8x32xf32, #tpu.memory_space<vmem>>, vector<8x32xf32>
    %c0_4 = arith.constant 0 : index
    %c0_5 = arith.constant 0 : index
    %9 = vector.load %arg4[%c0_4, %c0_5] : memref<32x32xf32, #tpu.memory_space<vmem>>, vector<32x32xf32>
    %cst_6 = arith.constant dense<0.000000e+00> : vector<8x32xf32>
    %10 = tpu.matmul %7, %9, %cst_6 {dimension_numbers = #tpu.dot_dimension_numbers<[1], [0], [0], [1], [0, 0, 1, 1], [], []>} : vector<8x32xf32>, vector<32x32xf32>, vector<8x32xf32> -> vector<8x32xf32>
    %11 = arith.addf %8, %10 : vector<8x32xf32>
    %c0_7 = arith.constant 0 : index
    %c0_8 = arith.constant 0 : index
    %12 = vector.load %arg6[%c0_7, %c0_8] : memref<8x32xf32, #tpu.memory_space<vmem>>, vector<8x32xf32>
    tpu.vector_store %arg6[%c0_7, %c0_8], %11 {strides = array<i32>} : memref<8x32xf32, #tpu.memory_space<vmem>>, vector<8x32xf32>,
    return
  }
  func.func @transform_0(%arg0: i32, %arg1: i32, %arg2: i32) -> (i32, i32) {
    %c0_i32 = arith.constant 0 : i32
    return %arg0, %arg2 : i32, i32
  }
  func.func @transform_1(%arg0: i32, %arg1: i32, %arg2: i32) -> (i32, i32) {
    %c0_i32 = arith.constant 0 : i32
    return %arg2, %arg1 : i32, i32
  }
  func.func @transform_2(%arg0: i32, %arg1: i32, %arg2: i32) -> (i32, i32) {
    %c0_i32 = arith.constant 0 : i32
    %c0_i32_0 = arith.constant 0 : i32
    return %c0_i32, %arg1 : i32, i32
  }
  func.func @transform_3(%arg0: i32, %arg1: i32, %arg2: i32) -> (i32, i32) {
    %c0_i32 = arith.constant 0 : i32
    return %arg0, %arg1 : i32, i32
  }
}

</mosaic_0001>

<bundles_post_ra>
// kernel: tpu_custom_call.1
= control target key start
LH: loop header
LB: loop body
LE: loop exit
PB: predicated region body
PF: predicated region fallthrough
CT: control target
= control target key end

     0   :  { %8 = vsyncpa [#allocation3], 0  ;;  %s233_s0 = inlined_call_operand.hbm [shape: f32[8,32], index: 0, kind: input, shape index: {}]   ;;  %s234_s1 = inlined_call_operand.hbm [shape: f32[32,32], index: 1, kind: input, shape index: {}]   ;;  %s235_s2 = inlined_call_operand.vmem [shape: f32[1,32], index: 2, kind: input, shape index: {}]   ;;  %s236_s3 = inlined_call_operand.hbm [shape: f32[8,32], index: 3, kind: output, shape index: {}]  }
   0x1   :  { %9 = vsyncpa [#allocation6], 0 }
   0x2   :  { %10 = vsyncpa [#allocation4], 0  ;;  %s16_s14 = sshll.u32 %s233_s0, 4  ;;  %s193_s15 = smov [#allocation2]   ;;  %s17_s14 = int_to_ptr.hbm [resolvable:$true] %s16_s14 }
   0x3   :  { %s18_s16 = sshll.u32 %s193_s15, 4  ;;  %s26_s19 = sshll.u32 %s234_s1, 4  ;;  %s19_s16 = int_to_ptr.vmem [resolvable:$true] %s18_s16  ;;  %s27_s19 = int_to_ptr.hbm [resolvable:$true] %s26_s19 }
   0x4   :  { %21 = dma.hbm_to_vmem [thread:$0]  %s17_s14, 128, %s19_s16, [#allocation3]  }
   0x5   :  { %s194_s20 = smov [#allocation5]   ;;  %s195_s22 = smov 128  }
   0x6   :  { %s28_s21 = sshll.u32 %s194_s20, 4  ;;  %s196_s23 = smov 8   ;;  %s29_s21 = int_to_ptr.vmem [resolvable:$true] %s28_s21 }
   0x7   :  { %34 = dma.hbm_to_vmem [thread:$0]  %s27_s19, 512, %s29_s21, [#allocation6], %s195_s22, %s195_s22, %s196_s23  }
   0x8   :  { %187 = dma.done.wait [#allocation3], 128  }
   0x9   :  { %188 = vsyncadd [#allocation3], 4294967168 }
   0xa   :  { %189 = dma.done.wait [#allocation6], 512  }
   0xb   :  { %190 = vsyncadd [#allocation6], 4294966784  ;;  %v63_v0 = vld [vmem:[#allocation5 + $0x18] sm:$0xff]  ;;  %v62_v1 = vld [vmem:[#allocation5 + $0x10] sm:$0xff]  ;;  %vm53_vm0 = vcmask 261120   ;;  %s197_s1 = smov [#allocation7]  }
   0xc   :  { %80 = vmatpush.msra.mxu0 %v63_v0  ;;  %v114_v2 = vld [vmem:[%s235_s2] ss:$0 sm:$0xff]  ;;  %v61_v3 = vld [vmem:[#allocation5 + $0x8] sm:$0xff]  ;;  %v60_v6 = vld [vmem:[#allocation5] sm:$0xff]  ;;  %s95_s25 = sshll.u32 %s197_s1, 4  ;;  %s97_s2 = sshll.u32 %s236_s3, 4  ;;  %s96_s25 = int_to_ptr.vmem [resolvable:$true] %s95_s25  ;;  %s98_s2 = int_to_ptr.hbm [resolvable:$true] %s97_s2 }
   0xd   :  { %v55_v4 = vld [vmem:[#allocation2] sm:$0xff]  ;;  %54 = vst.msk [vmem:[#allocation7] sm:$0xff] %vm53_vm0, %v114_v2 }
   0xe   :  { %81 = vmatpush.msra.mxu0 %v62_v1  ;;  %v56_v5 = vmul.f32 %v55_v4, %v55_v4 }
  0x10   :  { %82 = vmatpush.msra.mxu0 %v61_v3  ;;  %v57_v7 = vmul.f32 0.1, %v56_v5 }
  0x12   :  { %83 = vmatpush.msra.mxu0 %v60_v6  ;;  %v58_v8 = vadd.f32 %v57_v7, %v55_v4 }
  0x14   :  { %108 = vmatmul.msk.f32.vlgmr.msra.gmra.mxu0 %vm53_vm0, %v58_v8  ;;  %v59_v9 = vld [vmem:[#allocation7] sm:$0xff] }
  0x91   :  { %v85_v10 = vpop.f32.mrf.mxu0 }
  0x92   :  { %v88_v11 = vadd.f32 %v85_v10, %v59_v9 }
  0x94   :  { %89 = vst.msk [vmem:[#allocation7] sm:$0xff] %vm53_vm0, %v88_v11 }
  0x95   :  { %100 = dma.vmem_to_hbm [thread:$0]  %s96_s25, 128, %s98_s2, [#allocation4]  }
  0x96   :  { %191 = dma.done.wait [#allocation4], 128  }
  0x97   :  { %192 = vsyncadd [#allocation4], 4294967168 }
  0x98   :  { %105 = vsyncpa [#allocation3], 1 }
  0x99   :  { %106 = vsyncpa [#allocation6], 1 }
  0x9a   :  { %107 = vsyncpa [#allocation4], 1 }

</bundles_post_ra>
